<compile_context>
chip_gen: v5e
topology: v5e:2x2
jax: 0.10.0
libtpu: 0.0.40
codegen_flags: <defaults>
</compile_context>

<pallas_src>
import functools

import jax
import jax.numpy as jnp
from jax.experimental import pallas as pl
from jax.experimental.pallas import tpu as pltpu


def _round_up(x, m):
    return ((x + m - 1) // m) * m


def _focal_loss_kernel(logits_ref, target_ref, out_ref, *, alpha, gamma, n_valid,
                       tile_n, reduce_tile):
    x = logits_ref[...].astype(jnp.float32)              # (T, C)
    t, c = x.shape

    # Numerically stable log-softmax statistics along the class (lane) axis.
    m = jnp.max(x, axis=1, keepdims=True)                 # XLU reduce, (T, 1)
    z = x - m
    sumexp = jnp.sum(jnp.exp(z), axis=1, keepdims=True)   # EUP exp + XLU reduce
    lse = jnp.log(sumexp)                                  # (T, 1)

    # Gather z at the target class without materializing the full log-softmax.
    tgt = target_ref[...]                                  # (T, 1) int32
    cols = jax.lax.broadcasted_iota(jnp.int32, (t, c), 1)
    z_gt = jnp.sum(jnp.where(cols == tgt, z, 0.0), axis=1, keepdims=True)  # (T, 1)
    logpt_gt = z_gt - lse                                   # (T, 1)

    pt_gt = jnp.exp(logpt_gt)
    # exp(logpt) can round to slightly > 1, which would make pow() produce NaN.
    base = jnp.maximum(1.0 - pt_gt, 0.0)

    g = float(gamma)
    if g.is_integer() and 0 <= int(g) <= 8:
        # Integer gamma -> cheap VPU multiply chain instead of EUP exp(g*log(x)).
        w = jnp.ones_like(base)
        for _ in range(int(g)):
            w = w * base
    else:
        w = jnp.power(base, jnp.float32(g))

    loss = -jnp.float32(alpha) * w * logpt_gt               # (T, 1)

    # Zero out padded rows so sums / means over the global N stay exact.
    row = pl.program_id(0) * tile_n + jax.lax.broadcasted_iota(jnp.int32, (t, 1), 0)
    loss = jnp.where(row < n_valid, loss, 0.0)

    if reduce_tile:
        out_ref[...] = jnp.sum(loss, keepdims=True)          # (1, 1) partial per tile
    else:
        out_ref[...] = loss                                  # (T, 1) per-sample


def focal_loss(logits, target, weights=None, *, num_classes, alpha=0.25, gamma=2.0,
               aggregate="mean"):
    """Pallas TPU implementation of FocalLoss.forward.

    logits: f32/bf16 [N, C], target: int [N] or [N, 1].
    Returns f32 scalar for 'sum'/'mean', f32[N] for aggregate=None.
    `weights` is accepted for signature parity but unused (as in the PyTorch module).
    """
    assert aggregate in ("sum", "mean", None)
    assert logits.ndim == 2
    n, c = logits.shape
    assert c == num_classes

    target = target.reshape(-1).astype(jnp.int32)
    assert target.shape == (n,)
    target2d = target.reshape(n, 1)

    # Tile the batch axis. Budget ~4 MiB per logits buffer (double-buffered -> ~8 MiB),
    # which fits the 16 MiB v5e scoped-VMEM default and leaves headroom on v6e/v7x.
    bytes_per_row = c * logits.dtype.itemsize
    tile_cap = max(8, min(512, (4 * 1024 * 1024) // max(1, bytes_per_row)))
    tile_cap = (tile_cap // 8) * 8
    tile_n = min(tile_cap, _round_up(n, 8))
    n_pad = _round_up(n, tile_n)
    num_tiles = n_pad // tile_n

    if n_pad != n:
        logits = jnp.pad(logits, ((0, n_pad - n), (0, 0)))
        target2d = jnp.pad(target2d, ((0, n_pad - n), (0, 0)))

    reduce_tile = aggregate is not None
    kernel = functools.partial(
        _focal_loss_kernel,
        alpha=float(alpha),
        gamma=float(gamma),
        n_valid=n,
        tile_n=tile_n,
        reduce_tile=reduce_tile,
    )

    cost = pl.CostEstimate(
        flops=8 * n_pad * c,
        transcendentals=n_pad * c + 3 * n_pad,
        bytes_accessed=n_pad * c * logits.dtype.itemsize + n_pad * 4
        + (num_tiles * 4 if reduce_tile else n_pad * 4),
    )

    in_specs = [
        pl.BlockSpec((tile_n, c), lambda i: (i, 0)),
        pl.BlockSpec((tile_n, 1), lambda i: (i, 0)),
    ]
    if reduce_tile:
        out_shape = jax.ShapeDtypeStruct((num_tiles, 1), jnp.float32)
        out_spec = pl.BlockSpec((1, 1), lambda i: (i, 0))
    else:
        # TODO(synk): aggregate=None per-sample output stays [N, 1] (lane-width-1
        # masked stores); it is ~1/C of the input traffic so left as-is for safety.
        out_shape = jax.ShapeDtypeStruct((n_pad, 1), jnp.float32)
        out_spec = pl.BlockSpec((tile_n, 1), lambda i: (i, 0))

    out = pl.pallas_call(
        kernel,
        out_shape=out_shape,
        grid=(num_tiles,),
        in_specs=in_specs,
        out_specs=out_spec,
        compiler_params=pltpu.CompilerParams(dimension_semantics=("parallel",)),
        cost_estimate=cost,
    )(logits, target2d)

    if aggregate == "sum":
        return jnp.sum(out)                      # padded rows / tiles contribute 0
    if aggregate == "mean":
        return jnp.sum(out) / jnp.float32(n)     # divide by global N
    return out[:n, 0]


if __name__ == "__main__":
    num_classes = 32
    batch = 8
    alpha, gamma = 0.25, 2.0

    key = jax.random.PRNGKey(0)
    k1, k2 = jax.random.split(key)
    logits = jax.random.normal(k1, (batch, num_classes), dtype=jnp.float32)
    target = jax.random.randint(k2, (batch,), 0, num_classes, dtype=jnp.int32)

    # Plain-JAX reference.
    logpt = jax.nn.log_softmax(logits, axis=1)
    logpt_gt = jnp.take_along_axis(logpt, target[:, None], axis=1)[:, 0]
    pt_gt = jnp.exp(logpt_gt)
    ref_per_sample = -alpha * (1.0 - pt_gt) ** gamma * logpt_gt

    out_mean = jax.block_until_ready(
        focal_loss(logits, target, num_classes=num_classes, alpha=alpha, gamma=gamma,
                   aggregate="mean"))
    out_sum = jax.block_until_ready(
        focal_loss(logits, target, num_classes=num_classes, alpha=alpha, gamma=gamma,
                   aggregate="sum"))
    out_none = jax.block_until_ready(
        focal_loss(logits, target, num_classes=num_classes, alpha=alpha, gamma=gamma,
                   aggregate=None))

    assert jnp.allclose(out_mean, jnp.mean(ref_per_sample), rtol=1e-5, atol=1e-6), \
        (out_mean, jnp.mean(ref_per_sample))
    assert jnp.allclose(out_sum, jnp.sum(ref_per_sample), rtol=1e-5, atol=1e-6), \
        (out_sum, jnp.sum(ref_per_sample))
    assert jnp.allclose(out_none, ref_per_sample, rtol=1e-5, atol=1e-6), \
        (out_none, ref_per_sample)

    print("KERNEL_OK")
</pallas_src>

<mosaic_0001>
module attributes {stable_mosaic.version = 11 : i64} {
  func.func @_focal_loss_kernel(%arg0: i32, %arg1: memref<8x32xf32, #tpu.memory_space<vmem>>, %arg2: memref<8x1xi32, #tpu.memory_space<vmem>>, %arg3: memref<1x1xf32, #tpu.memory_space<vmem>>) attributes {dimension_semantics = [#tpu.dimension_semantics<parallel>], iteration_bounds = array<i64: 1>, scalar_prefetch = 0 : i64, scratch_operands = 0 : i64, tpu.core_type = #tpu.core_type<tc>, window_params = [{transform_indices = @transform_0, window_bounds = array<i64: 8, 32>}, {transform_indices = @transform_1, window_bounds = array<i64: 8, 1>}, {transform_indices = @transform_2, window_bounds = array<i64: 1, 1>}]} {
    %c0 = arith.constant 0 : index
    %c0_0 = arith.constant 0 : index
    %0 = vector.load %arg1[%c0, %c0_0] : memref<8x32xf32, #tpu.memory_space<vmem>>, vector<8x32xf32>
    %cst = arith.constant dense<0xFF800000> : vector<8xf32>
    %1 = vector.multi_reduction <maximumf>, %0, %cst [1] : vector<8x32xf32> to vector<8xf32>
    %2 = vector.shape_cast %1 : vector<8xf32> to vector<8x1xf32>
    %3 = vector.broadcast %2 : vector<8x1xf32> to vector<8x32xf32>
    %4 = arith.subf %0, %3 : vector<8x32xf32>
    %5 = math.exp %4 : vector<8x32xf32>
    %cst_1 = arith.constant dense<0.000000e+00> : vector<8xf32>
    %6 = vector.multi_reduction <add>, %5, %cst_1 [1] : vector<8x32xf32> to vector<8xf32>
    %7 = vector.shape_cast %6 : vector<8xf32> to vector<8x1xf32>
    %8 = math.log %7 : vector<8x1xf32>
    %c0_2 = arith.constant 0 : index
    %c0_3 = arith.constant 0 : index
    %9 = vector.load %arg2[%c0_2, %c0_3] : memref<8x1xi32, #tpu.memory_space<vmem>>, vector<8x1xi32>
    %10 = tpu.iota {dimensions = array<i32: 1>} : vector<8x32xi32>
    %11 = vector.broadcast %9 : vector<8x1xi32> to vector<8x32xi32>
    %12 = arith.cmpi eq, %10, %11 : vector<8x32xi32>
    %cst_4 = arith.constant 0.000000e+00 : f32
    %13 = vector.broadcast %cst_4 : f32 to vector<8x32xf32>
    %14 = arith.select %12, %4, %13 : vector<8x32xi1>, vector<8x32xf32>
    %cst_5 = arith.constant dense<0.000000e+00> : vector<8xf32>
    %15 = vector.multi_reduction <add>, %14, %cst_5 [1] : vector<8x32xf32> to vector<8xf32>
    %16 = vector.shape_cast %15 : vector<8xf32> to vector<8x1xf32>
    %17 = arith.subf %16, %8 : vector<8x1xf32>
    %18 = math.exp %17 : vector<8x1xf32>
    %cst_6 = arith.constant 1.000000e+00 : f32
    %19 = vector.broadcast %cst_6 : f32 to vector<8x1xf32>
    %20 = arith.subf %19, %18 : vector<8x1xf32>
    %cst_7 = arith.constant 0.000000e+00 : f32
    %21 = vector.broadcast %cst_7 : f32 to vector<8x1xf32>
    %22 = arith.maximumf %20, %21 : vector<8x1xf32>
    %cst_8 = arith.constant 1.000000e+00 : f32
    %23 = vector.broadcast %cst_8 : f32 to vector<8x1xf32>
    %24 = arith.mulf %23, %22 : vector<8x1xf32>
    %25 = arith.mulf %24, %22 : vector<8x1xf32>
    %cst_9 = arith.constant 0.000000e+00 : f32
    %cst_10 = arith.constant 2.500000e-01 : f32
    %26 = arith.subf %cst_9, %cst_10 : f32
    %27 = vector.broadcast %26 : f32 to vector<8x1xf32>
    %28 = arith.mulf %27, %25 : vector<8x1xf32>
    %29 = arith.mulf %28, %17 : vector<8x1xf32>
    %c8_i32 = arith.constant 8 : i32
    %30 = arith.muli %arg0, %c8_i32 : i32
    %31 = tpu.iota {dimensions = array<i32: 0>} : vector<8x1xi32>
    %32 = vector.broadcast %30 : i32 to vector<8x1xi32>
    %33 = arith.addi %32, %31 : vector<8x1xi32>
    %c8_i32_11 = arith.constant 8 : i32
    %34 = vector.broadcast %c8_i32_11 : i32 to vector<8x1xi32>
    %35 = arith.cmpi slt, %33, %34 : vector<8x1xi32>
    %cst_12 = arith.constant 0.000000e+00 : f32
    %36 = vector.broadcast %cst_12 : f32 to vector<8x1xf32>
    %37 = arith.select %35, %29, %36 : vector<8x1xi1>, vector<8x1xf32>
    %38 = vector.shape_cast %37 : vector<8x1xf32> to vector<1x8x1xf32>
    %cst_13 = arith.constant dense<0.000000e+00> : vector<1xf32>
    %39 = vector.multi_reduction <add>, %38, %cst_13 [1, 2] : vector<1x8x1xf32> to vector<1xf32>
    %40 = vector.shape_cast %39 : vector<1xf32> to vector<1x1x1xf32>
    %41 = vector.extract %40[0, 0, 0] : f32 from vector<1x1x1xf32>
    %42 = vector.broadcast %41 : f32 to vector<1x1xf32>
    %c0_14 = arith.constant 0 : index
    %c0_15 = arith.constant 0 : index
    %43 = vector.load %arg3[%c0_14, %c0_15] : memref<1x1xf32, #tpu.memory_space<vmem>>, vector<1x1xf32>
    tpu.vector_store %arg3[%c0_14, %c0_15], %42 {strides = array<i32>} : memref<1x1xf32, #tpu.memory_space<vmem>>, vector<1x1xf32>,
    return
  }
  func.func @transform_0(%arg0: i32) -> (i32, i32) {
    %c0_i32 = arith.constant 0 : i32
    %c0_i32_0 = arith.constant 0 : i32
    return %arg0, %c0_i32 : i32, i32
  }
  func.func @transform_1(%arg0: i32) -> (i32, i32) {
    %c0_i32 = arith.constant 0 : i32
    %c0_i32_0 = arith.constant 0 : i32
    return %arg0, %c0_i32 : i32, i32
  }
  func.func @transform_2(%arg0: i32) -> (i32, i32) {
    %c0_i32 = arith.constant 0 : i32
    %c0_i32_0 = arith.constant 0 : i32
    return %arg0, %c0_i32 : i32, i32
  }
}

</mosaic_0001>

<bundles_post_ra>
// kernel: tpu_custom_call.1
= control target key start
LH: loop header
LB: loop body
LE: loop exit
PB: predicated region body
PF: predicated region fallthrough
CT: control target
= control target key end

     0   :  { %vm13_vm0 = vcmask 261120   ;;  %s147_s0 = inlined_call_operand.vmem [shape: f32[8,32], index: 0, kind: input, shape index: {}]   ;;  %s148_s1 = inlined_call_operand.vmem [shape: s32[8,1], index: 1, kind: input, shape index: {}]   ;;  %s149_s2 = inlined_call_operand.hbm [shape: f32[1,1], index: 2, kind: output, shape index: {}]  }
   0x1   :  { %v12_v0 = vld [vmem:[%s147_s0] sm:$0xff] }
   0x2   :  { %7 = vsyncpa [#allocation3], 0  ;;  %v14_v1 = vsel %vm13_vm0, %v12_v0, -inf  ;;  %v118_v2 = vmov 0   ;;  %v25_v3 = vld [vmem:[%s148_s1] sm:$0xff]  ;;  %v26_v9 = vlaneseq  ;;  %vm51_vm2 = vcmask 7168  }
   0x3   :  { %85 = vset.pattern.permute.xlu0 %v118_v2  ;;  %s119_s0 = smov [#allocation2]   ;;  %s72_s15 = sshll.u32 %s149_s2, 4  ;;  %vm63_vm3 = vcmask 0   ;;  %s73_s15 = int_to_ptr.hbm [resolvable:$true] %s72_s15 }
   0x4   :  { %15 = vmax.xlane.f32.xlu0 %v14_v1  ;;  %v27_v10 = vand.u32 127, %v26_v9  ;;  %s70_s1 = sshll.u32 %s119_s0, 4  ;;  %s71_s1 = int_to_ptr.vmem [resolvable:$true] %s70_s1 }
  0x18   :  { %29 = vperm.xlu0 %85, %v25_v3  }
  0x77   :  { %v16_v4 = vpop.xlane.xlu0 %15 }
  0x78   :  { %v17_v5 = vsub.f32 %v12_v0, %v16_v4 }
  0x7a   :  { %v18_v6 = vmul.f32 1.442695, %v17_v5 }
  0x7c   :  { %86 = vpow2.f32 %v18_v6 }
  0x82   :  { %v87_v7 = vpop.eup %86 }
  0x83   :  { %v20_v8 = vsel %vm13_vm0, %v87_v7, 0.0 }
  0x84   :  { %21 = vadd.xlane.f32.xlu1 %v20_v8 }
  0x8a   :  { %v30_v11 = vpop.permute.xlu0 %29 }
  0x8b   :  { %vm31_vm1 = vcmp.eq.s32.totalorder %v27_v10, %v30_v11 }
  0x8c   :  { %v32_v12 = vsel %vm31_vm1, %v17_v5, 0.0 }
  0x8d   :  { %v33_v13 = vsel %vm13_vm0, %v32_v12, 0.0 }
  0x8e   :  { %34 = vadd.xlane.f32.xlu1 %v33_v13 }
  0xf7   :  { %v22_v14 = vpop.xlane.xlu1 %21 }
  0xf8   :  { %88 = vlog2.f32 %v22_v14 }
  0xfe   :  { %v89_v15 = vpop.eup %88 }
  0xff   :  { %v24_v16 = vmul.f32 0.6931472, %v89_v15 }
 0x101   :  { %v35_v17 = vpop.xlane.xlu1 %34 }
 0x102   :  { %v36_v18 = vsub.f32 %v35_v17, %v24_v16 }
 0x104   :  { %v37_v19 = vmul.f32 1.442695, %v36_v18 }
 0x106   :  { %90 = vpow2.f32 %v37_v19 }
 0x10c   :  { %v91_v20 = vpop.eup %90 }
 0x10d   :  { %v39_v21 = vsub.f32 1.0, %v91_v20 }
 0x10f   :  { %v40_v22 = vmax.f32 %v39_v21, 0.0 }
 0x111   :  { %v41_v23 = vmul.f32 %v40_v22, %v40_v22 }
 0x113   :  { %v42_v24 = vmul.f32 -0.25, %v41_v23 }
 0x115   :  { %v43_v25 = vmul.f32 %v42_v24, %v36_v18 }
 0x117   :  { %v52_v26 = vsel %vm51_vm2, %v43_v25, 0.0 }
 0x118   :  { %53 = vadd.xlane.f32.xlu2 %v52_v26 }
 0x18b   :  { %v54_v27 = vpop.xlane.xlu2 %53 }
 0x18c   :  { %v55_v28 = vrot.slane %v54_v27, 4 }
 0x18e   :  { %v56_v29 = vadd.f32 %v55_v28, %v54_v27 }
 0x190   :  { %v57_v30 = vrot.slane %v56_v29, 2 }
 0x192   :  { %v58_v31 = vadd.f32 %v57_v30, %v56_v29 }
 0x194   :  { %v59_v32 = vrot.slane %v58_v31, 1 }
 0x196   :  { %v60_v33 = vadd.f32 %v59_v32, %v58_v31 }
 0x198   :  { %81 = vpush %v60_v33 }
 0x1c9   :  { %s82_s16 = spop %81 }
 0x1ca   :  { %v62_v34 = vstv %s82_s16 }
 0x1cb   :  { %64 = vst.msk [vmem:[#allocation2] sm:$0x1] %vm63_vm3, %v62_v34 }
 0x1cc   :  { %75 = dma.vmem_to_hbm [thread:$0]  %s71_s1, 16, %s73_s15, [#allocation3]  }
 0x1cd   :  { %116 = dma.done.wait [#allocation3], 16  }
 0x1ce   :  { %117 = vsyncadd [#allocation3], 4294967280 }
 0x1cf   :  { %80 = vsyncpa [#allocation3], 1 }

</bundles_post_ra>
